<compile_context>
chip_gen: v5e
topology: v5e:2x2
jax: 0.10.0
libtpu: 0.0.40
codegen_flags: <defaults>
</compile_context>

<pallas_src>
import functools

import jax
import jax.numpy as jnp
from jax.experimental import pallas as pl
from jax.experimental.pallas import tpu as pltpu


def _ceil_div(a, b):
    return -(-a // b)


def _round_up(a, b):
    return _ceil_div(a, b) * b


def _vmem_budget():
    """Returns (per-input-tile byte budget, scoped-VMEM limit to request)."""
    try:
        cap = int(pltpu.get_tpu_info().vmem_capacity_bytes)
    except Exception:
        cap = 64 * 1024 * 1024          # conservative fallback: v7x per-TC VMEM
    cap = min(max(cap, 32 * 1024 * 1024), 128 * 1024 * 1024)
    # ~1/4 of capacity per input tile leaves room for the 2x double buffer plus
    # the (tiny) output block and scratch.  v5e/v6e -> 32 MiB, v7x -> 16 MiB.
    per_buf = cap // 4
    vmem_limit = min((cap * 3) // 4, 96 * 1024 * 1024)
    return per_buf, vmem_limit


# ----------------------------------------------------------------------------
# Kernel A: whole rows per grid step (TL == L).  One contiguous DMA, one
# reduce, one narrow store; no accumulator needed.
# ----------------------------------------------------------------------------
def _row_mean_full_kernel(x_ref, o_ref, *, inv_l):
    x = x_ref[...].astype(jnp.float32)
    o_ref[...] = (jnp.sum(x, axis=-1, keepdims=True) * inv_l).astype(o_ref.dtype)


# ----------------------------------------------------------------------------
# Kernel B: reduction axis split across grid axis 1 (last, "arbitrary") with an
# f32 accumulator resident across it; the last partial lane tile is masked
# in-kernel so no wrapper-side padding pass is needed.
# ----------------------------------------------------------------------------
def _row_mean_split_kernel(x_ref, o_ref, acc_ref, *, inv_l, true_l, lane_tile,
                           ragged):
    k = pl.program_id(1)

    @pl.when(k == 0)
    def _():
        acc_ref[...] = jnp.zeros_like(acc_ref)

    x = x_ref[...].astype(jnp.float32)
    if ragged:
        # Mask out-of-bounds lanes of the last partial tile (undefined data).
        lane = jax.lax.broadcasted_iota(jnp.int32, (1, lane_tile), 1)
        x = jnp.where(k * lane_tile + lane < true_l, x, 0.0)
    acc_ref[...] += jnp.sum(x, axis=-1, keepdims=True)

    @pl.when(k == pl.num_programs(1) - 1)
    def _():
        # Divide by the TRUE row length, not the padded one.
        o_ref[...] = (acc_ref[...] * inv_l).astype(o_ref.dtype)


def _row_mean(x2d: jax.Array, *, out_dtype, lane_tile=None, row_tile=None):
    """Row-wise mean of an (R, L) slab -> (Rp, 1); caller slices [:R]."""
    R, L = x2d.shape
    itemsize = jnp.dtype(x2d.dtype).itemsize
    # Sublane grain: 8 rows for 32-bit, 16 for bf16, 32 for 8-bit dtypes.
    grain = 8 * max(1, 4 // itemsize)
    per_buf, vmem_limit = _vmem_budget()

    # ---- lane (reduction) tile: prefer whole rows (contiguous DMA). --------
    if lane_tile is not None:
        tl = min(int(lane_tile), L)
        tl = L if tl >= L else max(128, (tl // 128) * 128)
    elif grain * L * itemsize <= per_buf:
        tl = L                                      # whole rows fit -> TL == L
    else:
        tl = max(128, (per_buf // (grain * itemsize)) // 128 * 128)
    split = tl < L

    # ---- row tile -----------------------------------------------------------
    if row_tile is not None:
        tr = int(row_tile)
    elif R <= grain:
        tr = R                        # block == full row extent (constraint waived)
    else:
        cap_rows = max(grain,
                       (min(per_buf // (tl * itemsize), 2048) // grain) * grain)
        tr = min(cap_rows, _round_up(R, grain))
        # v7x has 2 TensorCores: make sure the "parallel" axis has >= 2 blocks.
        if _ceil_div(R, tr) < 2:
            tr = max(grain, _round_up(_ceil_div(R, 2), grain))
        # TODO(synk): for R <= grain with a split reduction axis, a 2-way
        # partial-sum output over a leading parallel axis would let both v7x
        # TCs stream; single-core execution is still correct, so keep it simple.

    n_rows = _ceil_div(R, tr)
    rp = n_rows * tr                  # padded output rows (sliced off by caller)
    inv_l = 1.0 / float(L)

    params = pltpu.CompilerParams(
        dimension_semantics=("parallel",) if not split
        else ("parallel", "arbitrary"),
        vmem_limit_bytes=vmem_limit,
    )

    if not split:
        return pl.pallas_call(
            functools.partial(_row_mean_full_kernel, inv_l=inv_l),
            out_shape=jax.ShapeDtypeStruct((rp, 1), out_dtype),
            grid=(n_rows,),
            in_specs=[pl.BlockSpec((tr, L), lambda i: (i, 0))],
            out_specs=pl.BlockSpec((tr, 1), lambda i: (i, 0)),
            compiler_params=params,
        )(x2d)

    n_lane = _ceil_div(L, tl)
    return pl.pallas_call(
        functools.partial(_row_mean_split_kernel, inv_l=inv_l, true_l=L,
                          lane_tile=tl, ragged=(L % tl != 0)),
        out_shape=jax.ShapeDtypeStruct((rp, 1), out_dtype),
        grid=(n_rows, n_lane),
        in_specs=[pl.BlockSpec((tr, tl), lambda i, k: (i, k))],
        out_specs=pl.BlockSpec((tr, 1), lambda i, k: (i, 0)),
        scratch_shapes=[pltpu.VMEM((tr, 1), jnp.float32)],
        compiler_params=params,
    )(x2d)


def spatial_mean_nchw(x: jax.Array, *, min_pallas_elems: int = 1 << 20,
                      lane_tile=None, row_tile=None) -> jax.Array:
    """Pallas-backed equivalent of `lambda x: x.mean(dim=(2, 3))` on NCHW."""
    N, C, H, W = x.shape
    # Integer inputs: return an f32 mean (PyTorch .mean would raise on ints).
    out_dtype = x.dtype if jnp.issubdtype(x.dtype, jnp.floating) else jnp.float32

    # Tiny tensors: a standalone pallas_call is pure launch/DMA-setup overhead.
    if x.size < max(min_pallas_elems, 1):
        return jnp.mean(x, axis=(2, 3), dtype=jnp.float32).astype(out_dtype)

    r, l = N * C, H * W
    x2d = x.reshape(r, l)             # free reshape; native dtype, no pad pass
    out = _row_mean(x2d, out_dtype=out_dtype,
                    lane_tile=lane_tile, row_tile=row_tile)     # (rp, 1)
    return out[:r, 0].reshape(N, C)


# ----------------------------------------------------------------------------
# Expression: faithful translation of the nn.Module (no parameters).
# ----------------------------------------------------------------------------
class Expression:
    def __init__(self, func):
        self.func = func

    def __call__(self, x):
        return self.func(x)


if __name__ == "__main__":
    key = jax.random.PRNGKey(0)
    k1, k2, k3 = jax.random.split(key, 3)

    # min_pallas_elems=0 forces the Pallas path even at these tiny test shapes.
    expr = Expression(functools.partial(spatial_mean_nchw, min_pallas_elems=0))

    # Test 1: small f32 NCHW feature map (single-pass, whole-row contiguous DMA).
    x1 = jax.random.normal(k1, (2, 4, 16, 16), dtype=jnp.float32)
    y1 = jax.block_until_ready(expr(x1))
    ref1 = jnp.mean(x1, axis=(2, 3))
    assert y1.shape == (2, 4)
    assert jnp.allclose(y1, ref1, atol=1e-5, rtol=1e-5)

    # Test 2: bf16 input — native-dtype read with f32 accumulation, row count
    # (6) below the sublane grain handled via a full-extent row block (no pad).
    x2 = jax.random.normal(k2, (2, 3, 48, 48), dtype=jnp.bfloat16)
    y2 = jax.block_until_ready(expr(x2))
    ref2 = jnp.mean(x2.astype(jnp.float32), axis=(2, 3))
    assert y2.shape == (2, 3)
    assert y2.dtype == jnp.bfloat16
    assert jnp.allclose(y2.astype(jnp.float32), ref2, atol=1e-2)

    # Test 3: forced split-reduction path with ragged rows (10) and ragged
    # lanes (900): exercises cdiv grids + in-kernel lane masking, no jnp.pad.
    x3 = jax.random.normal(k3, (2, 5, 30, 30), dtype=jnp.float32)
    y3 = jax.block_until_ready(
        spatial_mean_nchw(x3, min_pallas_elems=0, lane_tile=256, row_tile=8))
    ref3 = jnp.mean(x3, axis=(2, 3))
    assert y3.shape == (2, 5)
    assert jnp.allclose(y3, ref3, atol=1e-4, rtol=1e-4)

    print("KERNEL_OK")
</pallas_src>

<mosaic_0001>
module attributes {stable_mosaic.version = 11 : i64} {
  func.func @_row_mean_full_kernel(%arg0: i32, %arg1: memref<8x256xf32, #tpu.memory_space<vmem>>, %arg2: memref<8x1xf32, #tpu.memory_space<vmem>>) attributes {dimension_semantics = [#tpu.dimension_semantics<parallel>], iteration_bounds = array<i64: 1>, scalar_prefetch = 0 : i64, scratch_operands = 0 : i64, tpu.core_type = #tpu.core_type<tc>, window_params = [{transform_indices = @transform_0, window_bounds = array<i64: 8, 256>}, {transform_indices = @transform_1, window_bounds = array<i64: 8, 1>}]} {
    %c0 = arith.constant 0 : index
    %c0_0 = arith.constant 0 : index
    %0 = vector.load %arg1[%c0, %c0_0] : memref<8x256xf32, #tpu.memory_space<vmem>>, vector<8x256xf32>
    %cst = arith.constant dense<0.000000e+00> : vector<8xf32>
    %1 = vector.multi_reduction <add>, %0, %cst [1] : vector<8x256xf32> to vector<8xf32>
    %2 = vector.shape_cast %1 : vector<8xf32> to vector<8x1xf32>
    %cst_1 = arith.constant 3.906250e-03 : f32
    %3 = vector.broadcast %cst_1 : f32 to vector<8x1xf32>
    %4 = arith.mulf %2, %3 : vector<8x1xf32>
    %c0_2 = arith.constant 0 : index
    %c0_3 = arith.constant 0 : index
    %5 = vector.load %arg2[%c0_2, %c0_3] : memref<8x1xf32, #tpu.memory_space<vmem>>, vector<8x1xf32>
    tpu.vector_store %arg2[%c0_2, %c0_3], %4 {strides = array<i32>} : memref<8x1xf32, #tpu.memory_space<vmem>>, vector<8x1xf32>,
    return
  }
  func.func @transform_0(%arg0: i32) -> (i32, i32) {
    %c0_i32 = arith.constant 0 : i32
    %c0_i32_0 = arith.constant 0 : i32
    return %arg0, %c0_i32 : i32, i32
  }
  func.func @transform_1(%arg0: i32) -> (i32, i32) {
    %c0_i32 = arith.constant 0 : i32
    %c0_i32_0 = arith.constant 0 : i32
    return %arg0, %c0_i32 : i32, i32
  }
}

</mosaic_0001>

<bundles_post_ra>
// kernel: tpu_custom_call.1
= control target key start
LH: loop header
LB: loop body
LE: loop exit
PB: predicated region body
PF: predicated region fallthrough
CT: control target
= control target key end

     0   :  { %6 = vsyncpa [#allocation3], 0  ;;  %s62_s9 = smov [#allocation2]   ;;  %s79_s0 = inlined_call_operand.hbm [shape: f32[8,256], index: 0, kind: input, shape index: {}]   ;;  %s80_s1 = inlined_call_operand.vmem [shape: f32[8,1], index: 1, kind: output, shape index: {}]  }
   0x1   :  { %s12_s8 = sshll.u32 %s79_s0, 4  ;;  %s14_s10 = sshll.u32 %s62_s9, 4  ;;  %s13_s8 = int_to_ptr.hbm [resolvable:$true] %s12_s8  ;;  %s15_s10 = int_to_ptr.vmem [resolvable:$true] %s14_s10 }
   0x2   :  { %17 = dma.hbm_to_vmem [thread:$0]  %s13_s8, 256, %s15_s10, [#allocation3]  }
   0x3   :  { %60 = dma.done.wait [#allocation3], 256  }
   0x4   :  { %61 = vsyncadd [#allocation3], 4294967040  ;;  %v22_v0 = vld [vmem:[#allocation2] sm:$0xff]  ;;  %v23_v1 = vld [vmem:[#allocation2 + $0x8] sm:$0xff]  ;;  %vm28_vm0 = vcmask 7168  }
   0x5   :  { %v24_v2 = vadd.f32 %v23_v1, %v22_v0 }
   0x7   :  { %25 = vadd.xlane.f32.xlu0 %v24_v2 }
  0x7a   :  { %v26_v3 = vpop.xlane.xlu0 %25 }
  0x7b   :  { %v27_v4 = vmul.f32 0.00390625, %v26_v3 }
  0x7d   :  { %29 = vst.msk [vmem:[%s80_s1] sm:$0xff] %vm28_vm0, %v27_v4 }
  0x7e   :  { %34 = vsyncpa [#allocation3], 1 }

</bundles_post_ra>
